<compile_context>
chip_gen: v7x
topology: tpu7x:2x2x1
jax: 0.10.0
libtpu: 0.0.40
codegen_flags: <defaults>
</compile_context>

<pallas_src>
import functools

import jax
import jax.numpy as jnp
from jax.experimental import pallas as pl
from jax.experimental.pallas import tpu as pltpu


def _loss_kernel(a_ref, p_ref, n_ref, o_ref, acc_ref, *, margin, inv_t, mode,
                 batch, block_rows, n_inner, needs_mask):
    i = pl.program_id(1)  # inner (batch-reduction) axis

    @pl.when(i == 0)
    def _init():
        acc_ref[...] = jnp.zeros_like(acc_ref)

    a = a_ref[...].astype(jnp.float32)
    p = p_ref[...].astype(jnp.float32)
    n = n_ref[...].astype(jnp.float32)

    # clamp(norm, 1e-8) == sqrt(max(sum_sq, 1e-16)); rsqrt (EUP slot) + mul
    # instead of sqrt + divide on the VPU critical path.
    eps2 = jnp.float32(1e-16)
    inv_a = jax.lax.rsqrt(jnp.maximum(jnp.sum(a * a, axis=-1, keepdims=True), eps2))
    inv_p = jax.lax.rsqrt(jnp.maximum(jnp.sum(p * p, axis=-1, keepdims=True), eps2))
    inv_n = jax.lax.rsqrt(jnp.maximum(jnp.sum(n * n, axis=-1, keepdims=True), eps2))

    pos_sim = jnp.sum(a * p, axis=-1, keepdims=True) * (inv_a * inv_p)
    neg_sim = jnp.sum(a * n, axis=-1, keepdims=True) * (inv_a * inv_n)

    if mode == "triplet":
        per_row = jnp.maximum(neg_sim - pos_sim + jnp.float32(margin),
                              jnp.float32(0.0))
    else:  # cosine: -log(e^{p/T} / (e^{p/T} + e^{n/T})) == softplus((n-p)/T)
        z = (neg_sim - pos_sim) * jnp.float32(inv_t)
        per_row = jnp.maximum(z, jnp.float32(0.0)) + jnp.log1p(jnp.exp(-jnp.abs(z)))

    if needs_mask:
        # Global row index of each row in this tile; rows >= batch are either
        # the OOB tail of a partial tile or a clamped/duplicated tile -> zero
        # them before accumulating (they would otherwise add `margin` in
        # triplet mode or log(2) in cosine mode).
        tile_lin = pl.program_id(0) * n_inner + i
        row = tile_lin * block_rows + jax.lax.broadcasted_iota(
            jnp.int32, per_row.shape, 0)
        per_row = jnp.where(row < batch, per_row, jnp.float32(0.0))

    # Vector accumulator: one full-tile add per step; no per-step XLU reduce
    # and no serialized scalar read-modify-write chain.
    acc_ref[...] += per_row

    @pl.when(i == pl.num_programs(1) - 1)
    def _finalize():
        total = jnp.sum(acc_ref[...])
        rows = jax.lax.broadcasted_iota(jnp.int32, o_ref.shape, 0)
        cols = jax.lax.broadcasted_iota(jnp.int32, o_ref.shape, 1)
        # Partial sum in [0, 0] of this core's (8, 128) output block, zeros
        # elsewhere, so the wrapper can just jnp.sum the whole output.
        o_ref[...] = jnp.where((rows == 0) & (cols == 0), total,
                               jnp.float32(0.0))


def _auto_config():
    """Generation-specific (vmem_limit_bytes, hbm_bytes_per_operand_per_step)."""
    vmem_cap = None
    try:
        info = pltpu.get_tpu_info()
        vmem_cap = getattr(info, "vmem_capacity_bytes", None)
    except Exception:
        vmem_cap = None
    mib = 1024 * 1024
    if vmem_cap:
        if vmem_cap <= 64 * mib:
            # v7x-class: 64 MiB VMEM per TC, ~3.2 TB/s HBM -> larger HBM bytes
            # per step to hide the fixed grid-step overhead, tighter VMEM cap.
            return min(48 * mib, (int(vmem_cap) * 3) // 4), 6 * mib
        # v5e/v6e-class: 128 MiB physical VMEM (scoped default is much lower).
        return 64 * mib, 4 * mib
    # Unknown backend (e.g. interpret mode): conservative, safe everywhere.
    return 48 * mib, 4 * mib


def _pick_block_rows(B, D, itemsize, hbm_target_bytes, vmem_limit_bytes):
    """Batch tile size: dtype-aware, VMEM- and HBM-throughput-budgeted."""
    # Sublane packing: 8 rows for 32-bit, 16 for 16-bit, 32 for 8-bit dtypes.
    sublane_pack = max(8, 32 // max(1, itemsize))
    d_pad = max(128, -(-D // 128) * 128)  # lanes pad to 128 in VMEM
    # VMEM bytes per batch row: 3 operands x 2 pipeline buffers of the lane-
    # padded tile, plus the lane-padded (tb, 1) f32 accumulator (128 lanes).
    per_row_vmem = 6 * d_pad * itemsize + 128 * 4
    budget = max(vmem_limit_bytes - 8 * 1024 * 1024, vmem_limit_bytes // 2)
    tb_vmem = max(sublane_pack, budget // per_row_vmem)
    # HBM bytes actually moved per operand per step are tb * D * itemsize
    # (not the lane-padded size) — size so each step is >> the ~0.35us step
    # overhead on the fastest-HBM generation.
    tb_hbm = max(sublane_pack, hbm_target_bytes // max(1, D * itemsize))
    tb = min(tb_vmem, tb_hbm)
    tb = max(sublane_pack, (tb // sublane_pack) * sublane_pack)
    if tb >= B:
        return B  # single tile over the whole batch (block == full array dim)
    return int(tb)


def pairwise_contrastive_loss(anchor, positive, negative,
                              margin=1.0, temperature=0.07, mode="triplet",
                              block_rows=None):
    """Pallas implementation of PairwiseContrastiveLoss.forward.

    anchor/positive/negative: (B, D) arrays; reduction over the full batch.
    Returns a scalar float32 loss.
    """
    B, D = anchor.shape
    assert positive.shape == (B, D) and negative.shape == (B, D)
    if mode not in ("triplet", "cosine"):
        raise ValueError(f"Unsupported mode: {mode}")

    itemsize = jnp.dtype(anchor.dtype).itemsize
    vmem_limit_bytes, hbm_target_bytes = _auto_config()

    if block_rows is None:
        tb = _pick_block_rows(B, D, itemsize, hbm_target_bytes, vmem_limit_bytes)
    else:
        tb = max(1, int(block_rows))
        if tb >= B:
            tb = B
        else:
            tb = max(8, (tb // 8) * 8)  # keep the (8, 128) block constraint
            if tb >= B:
                tb = B

    n_tiles = -(-B // tb)
    # Split batch tiles across the two TensorCores on v7x whenever there is
    # more than one tile (never fall back to a single core for odd counts);
    # on single-core chips the outer axis just runs sequentially.
    n_outer = 2 if n_tiles >= 2 else 1
    n_inner = -(-n_tiles // n_outer)
    covered = n_outer * n_inner * tb
    needs_mask = covered != B
    last_tile = n_tiles - 1

    def row_index_map(o, i):
        t = o * n_inner + i
        # Clamp so the DMA never starts past the array; duplicated / partial
        # tiles are zeroed by the in-kernel row mask.
        return (jnp.minimum(t, last_tile), 0)

    row_spec = pl.BlockSpec((tb, D), row_index_map)
    out_spec = pl.BlockSpec((8, 128), lambda o, i: (o, 0))

    kernel = functools.partial(
        _loss_kernel,
        margin=float(margin),
        inv_t=1.0 / float(temperature),
        mode=mode,
        batch=B,
        block_rows=tb,
        n_inner=n_inner,
        needs_mask=needs_mask,
    )

    out = pl.pallas_call(
        kernel,
        out_shape=jax.ShapeDtypeStruct((n_outer * 8, 128), jnp.float32),
        grid_spec=pltpu.PrefetchScalarGridSpec(
            num_scalar_prefetch=0,
            grid=(n_outer, n_inner),
            in_specs=[row_spec, row_spec, row_spec],
            out_specs=out_spec,
            scratch_shapes=[pltpu.VMEM((tb, 1), jnp.float32)],
        ),
        compiler_params=pltpu.CompilerParams(
            dimension_semantics=("parallel", "arbitrary"),
            vmem_limit_bytes=vmem_limit_bytes,
        ),
    )(anchor, positive, negative)

    # Only element [0, 0] of each core's block is non-zero -> sum is exact.
    return jnp.sum(out) / jnp.float32(B)


def _reference_loss(anchor, positive, negative,
                    margin=1.0, temperature=0.07, mode="triplet"):
    eps = 1e-8

    def cos(x, y):
        xn = jnp.maximum(jnp.linalg.norm(x, axis=-1), eps)
        yn = jnp.maximum(jnp.linalg.norm(y, axis=-1), eps)
        return jnp.sum(x * y, axis=-1) / (xn * yn)

    pos_sim = cos(anchor, positive)
    neg_sim = cos(anchor, negative)
    if mode == "triplet":
        return jnp.mean(jnp.maximum(neg_sim - pos_sim + margin, 0.0))
    exp_pos = jnp.exp(pos_sim / temperature)
    exp_neg = jnp.exp(neg_sim / temperature)
    return jnp.mean(-jnp.log(exp_pos / (exp_pos + exp_neg)))


if __name__ == "__main__":
    key = jax.random.PRNGKey(0)
    k1, k2, k3 = jax.random.split(key, 3)

    ok = True

    # Primary small-shape demo: batch of 16 embedding triplets, hidden=32.
    B, D = 16, 32
    anchor = jax.random.normal(k1, (B, D), dtype=jnp.float32)
    positive = jax.random.normal(k2, (B, D), dtype=jnp.float32)
    negative = jax.random.normal(k3, (B, D), dtype=jnp.float32)
    for mode in ("triplet", "cosine"):
        loss = jax.block_until_ready(
            pairwise_contrastive_loss(anchor, positive, negative, mode=mode))
        ref = _reference_loss(anchor, positive, negative, mode=mode)
        if not jnp.allclose(loss, ref, atol=1e-5, rtol=1e-5):
            ok = False
            print(f"MISMATCH mode={mode}: kernel={loss} ref={ref}")

    # Exercise the multi-tile path: ragged batch (B=22, tb=8 -> 3 tiles), odd
    # tile count split across the 2-wide parallel axis (clamped duplicate
    # tile) and a partial last tile -- all handled by the in-kernel row mask.
    B2, D2 = 22, 32
    a2 = jax.random.normal(k1, (B2, D2), dtype=jnp.float32)
    p2 = jax.random.normal(k2, (B2, D2), dtype=jnp.float32)
    n2 = jax.random.normal(k3, (B2, D2), dtype=jnp.float32)
    for mode in ("triplet", "cosine"):
        loss = jax.block_until_ready(
            pairwise_contrastive_loss(a2, p2, n2, mode=mode, block_rows=8))
        ref = _reference_loss(a2, p2, n2, mode=mode)
        if not jnp.allclose(loss, ref, atol=1e-5, rtol=1e-5):
            ok = False
            print(f"MISMATCH ragged mode={mode}: kernel={loss} ref={ref}")

    if ok:
        print("KERNEL_OK")
</pallas_src>

<mosaic_0001>
module attributes {stable_mosaic.version = 11 : i64} {
  func.func @_loss_kernel(%arg0: i32, %arg1: i32, %arg2: memref<16x32xf32, #tpu.memory_space<vmem>>, %arg3: memref<16x32xf32, #tpu.memory_space<vmem>>, %arg4: memref<16x32xf32, #tpu.memory_space<vmem>>, %arg5: memref<8x128xf32, #tpu.memory_space<vmem>>, %arg6: memref<16x1xf32, #tpu.memory_space<vmem>>) attributes {dimension_semantics = [#tpu.dimension_semantics<parallel>, #tpu.dimension_semantics<arbitrary>], iteration_bounds = array<i64: 1, 1>, scalar_prefetch = 0 : i64, scratch_operands = 1 : i64, tpu.core_type = #tpu.core_type<tc>, window_params = [{transform_indices = @transform_0, window_bounds = array<i64: 16, 32>}, {transform_indices = @transform_1, window_bounds = array<i64: 16, 32>}, {transform_indices = @transform_2, window_bounds = array<i64: 16, 32>}, {transform_indices = @transform_3, window_bounds = array<i64: 8, 128>}]} {
    %c0_i32 = arith.constant 0 : i32
    %0 = arith.cmpi eq, %arg1, %c0_i32 : i32
    %1 = arith.extui %0 : i1 to i32
    %c0_i32_0 = arith.constant 0 : i32
    %2 = arith.cmpi ne, %1, %c0_i32_0 : i32
    scf.if %2 {
      %cst_21 = arith.constant 0.000000e+00 : f32
      %45 = vector.broadcast %cst_21 : f32 to vector<16x1xf32>
      %c0_22 = arith.constant 0 : index
      %c0_23 = arith.constant 0 : index
      %46 = vector.load %arg6[%c0_22, %c0_23] : memref<16x1xf32, #tpu.memory_space<vmem>>, vector<16x1xf32>
      tpu.vector_store %arg6[%c0_22, %c0_23], %45 {strides = array<i32>} : memref<16x1xf32, #tpu.memory_space<vmem>>, vector<16x1xf32>,
    } else {
    }
    %c0 = arith.constant 0 : index
    %c0_1 = arith.constant 0 : index
    %3 = vector.load %arg2[%c0, %c0_1] : memref<16x32xf32, #tpu.memory_space<vmem>>, vector<16x32xf32>
    %c0_2 = arith.constant 0 : index
    %c0_3 = arith.constant 0 : index
    %4 = vector.load %arg3[%c0_2, %c0_3] : memref<16x32xf32, #tpu.memory_space<vmem>>, vector<16x32xf32>
    %c0_4 = arith.constant 0 : index
    %c0_5 = arith.constant 0 : index
    %5 = vector.load %arg4[%c0_4, %c0_5] : memref<16x32xf32, #tpu.memory_space<vmem>>, vector<16x32xf32>
    %6 = arith.mulf %3, %3 : vector<16x32xf32>
    %cst = arith.constant dense<0.000000e+00> : vector<16xf32>
    %7 = vector.multi_reduction <add>, %6, %cst [1] : vector<16x32xf32> to vector<16xf32>
    %8 = vector.shape_cast %7 : vector<16xf32> to vector<16x1xf32>
    %cst_6 = arith.constant 1.000000e-16 : f32
    %9 = vector.broadcast %cst_6 : f32 to vector<16x1xf32>
    %10 = arith.maximumf %8, %9 : vector<16x1xf32>
    %11 = math.rsqrt %10 : vector<16x1xf32>
    %12 = arith.mulf %4, %4 : vector<16x32xf32>
    %cst_7 = arith.constant dense<0.000000e+00> : vector<16xf32>
    %13 = vector.multi_reduction <add>, %12, %cst_7 [1] : vector<16x32xf32> to vector<16xf32>
    %14 = vector.shape_cast %13 : vector<16xf32> to vector<16x1xf32>
    %cst_8 = arith.constant 1.000000e-16 : f32
    %15 = vector.broadcast %cst_8 : f32 to vector<16x1xf32>
    %16 = arith.maximumf %14, %15 : vector<16x1xf32>
    %17 = math.rsqrt %16 : vector<16x1xf32>
    %18 = arith.mulf %5, %5 : vector<16x32xf32>
    %cst_9 = arith.constant dense<0.000000e+00> : vector<16xf32>
    %19 = vector.multi_reduction <add>, %18, %cst_9 [1] : vector<16x32xf32> to vector<16xf32>
    %20 = vector.shape_cast %19 : vector<16xf32> to vector<16x1xf32>
    %cst_10 = arith.constant 1.000000e-16 : f32
    %21 = vector.broadcast %cst_10 : f32 to vector<16x1xf32>
    %22 = arith.maximumf %20, %21 : vector<16x1xf32>
    %23 = math.rsqrt %22 : vector<16x1xf32>
    %24 = arith.mulf %3, %4 : vector<16x32xf32>
    %cst_11 = arith.constant dense<0.000000e+00> : vector<16xf32>
    %25 = vector.multi_reduction <add>, %24, %cst_11 [1] : vector<16x32xf32> to vector<16xf32>
    %26 = vector.shape_cast %25 : vector<16xf32> to vector<16x1xf32>
    %27 = arith.mulf %11, %17 : vector<16x1xf32>
    %28 = arith.mulf %26, %27 : vector<16x1xf32>
    %29 = arith.mulf %3, %5 : vector<16x32xf32>
    %cst_12 = arith.constant dense<0.000000e+00> : vector<16xf32>
    %30 = vector.multi_reduction <add>, %29, %cst_12 [1] : vector<16x32xf32> to vector<16xf32>
    %31 = vector.shape_cast %30 : vector<16xf32> to vector<16x1xf32>
    %32 = arith.mulf %11, %23 : vector<16x1xf32>
    %33 = arith.mulf %31, %32 : vector<16x1xf32>
    %34 = arith.subf %33, %28 : vector<16x1xf32>
    %cst_13 = arith.constant 1.000000e+00 : f32
    %35 = vector.broadcast %cst_13 : f32 to vector<16x1xf32>
    %36 = arith.addf %34, %35 : vector<16x1xf32>
    %cst_14 = arith.constant 0.000000e+00 : f32
    %37 = vector.broadcast %cst_14 : f32 to vector<16x1xf32>
    %38 = arith.maximumf %36, %37 : vector<16x1xf32>
    %c0_15 = arith.constant 0 : index
    %c0_16 = arith.constant 0 : index
    %39 = vector.load %arg6[%c0_15, %c0_16] : memref<16x1xf32, #tpu.memory_space<vmem>>, vector<16x1xf32>
    %40 = arith.addf %39, %38 : vector<16x1xf32>
    %c0_17 = arith.constant 0 : index
    %c0_18 = arith.constant 0 : index
    %41 = vector.load %arg6[%c0_17, %c0_18] : memref<16x1xf32, #tpu.memory_space<vmem>>, vector<16x1xf32>
    tpu.vector_store %arg6[%c0_17, %c0_18], %40 {strides = array<i32>} : memref<16x1xf32, #tpu.memory_space<vmem>>, vector<16x1xf32>,
    %c0_i32_19 = arith.constant 0 : i32
    %42 = arith.cmpi eq, %arg1, %c0_i32_19 : i32
    %43 = arith.extui %42 : i1 to i32
    %c0_i32_20 = arith.constant 0 : i32
    %44 = arith.cmpi ne, %43, %c0_i32_20 : i32
    scf.if %44 {
      %c0_21 = arith.constant 0 : index
      %c0_22 = arith.constant 0 : index
      %45 = vector.load %arg6[%c0_21, %c0_22] : memref<16x1xf32, #tpu.memory_space<vmem>>, vector<16x1xf32>
      %46 = vector.shape_cast %45 : vector<16x1xf32> to vector<1x16x1xf32>
      %cst_23 = arith.constant dense<0.000000e+00> : vector<1xf32>
      %47 = vector.multi_reduction <add>, %46, %cst_23 [1, 2] : vector<1x16x1xf32> to vector<1xf32>
      %48 = vector.shape_cast %47 : vector<1xf32> to vector<1x1x1xf32>
      %49 = vector.extract %48[0, 0, 0] : f32 from vector<1x1x1xf32>
      %50 = tpu.iota {dimensions = array<i32: 0>} : vector<8x128xi32>
      %51 = tpu.iota {dimensions = array<i32: 1>} : vector<8x128xi32>
      %c0_i32_24 = arith.constant 0 : i32
      %52 = vector.broadcast %c0_i32_24 : i32 to vector<8x128xi32>
      %53 = arith.cmpi eq, %50, %52 : vector<8x128xi32>
      %c0_i32_25 = arith.constant 0 : i32
      %54 = vector.broadcast %c0_i32_25 : i32 to vector<8x128xi32>
      %55 = arith.cmpi eq, %51, %54 : vector<8x128xi32>
      %56 = arith.andi %53, %55 : vector<8x128xi1>
      %cst_26 = arith.constant 0.000000e+00 : f32
      %57 = vector.broadcast %49 : f32 to vector<8x128xf32>
      %58 = vector.broadcast %cst_26 : f32 to vector<8x128xf32>
      %59 = arith.select %56, %57, %58 : vector<8x128xi1>, vector<8x128xf32>
      %c0_27 = arith.constant 0 : index
      %c0_28 = arith.constant 0 : index
      %60 = vector.load %arg5[%c0_27, %c0_28] : memref<8x128xf32, #tpu.memory_space<vmem>>, vector<8x128xf32>
      tpu.vector_store %arg5[%c0_27, %c0_28], %59 {strides = array<i32>} : memref<8x128xf32, #tpu.memory_space<vmem>>, vector<8x128xf32>,
    } else {
    }
    return
  }
  func.func @transform_0(%arg0: i32, %arg1: i32) -> (i32, i32) {
    %c1_i32 = arith.constant 1 : i32
    %0 = arith.muli %arg0, %c1_i32 : i32
    %1 = arith.addi %0, %arg1 : i32
    %c0_i32 = arith.constant 0 : i32
    %2 = arith.minsi %1, %c0_i32 : i32
    %c0_i32_0 = arith.constant 0 : i32
    %c0_i32_1 = arith.constant 0 : i32
    return %2, %c0_i32_0 : i32, i32
  }
  func.func @transform_1(%arg0: i32, %arg1: i32) -> (i32, i32) {
    %c1_i32 = arith.constant 1 : i32
    %0 = arith.muli %arg0, %c1_i32 : i32
    %1 = arith.addi %0, %arg1 : i32
    %c0_i32 = arith.constant 0 : i32
    %2 = arith.minsi %1, %c0_i32 : i32
    %c0_i32_0 = arith.constant 0 : i32
    %c0_i32_1 = arith.constant 0 : i32
    return %2, %c0_i32_0 : i32, i32
  }
  func.func @transform_2(%arg0: i32, %arg1: i32) -> (i32, i32) {
    %c1_i32 = arith.constant 1 : i32
    %0 = arith.muli %arg0, %c1_i32 : i32
    %1 = arith.addi %0, %arg1 : i32
    %c0_i32 = arith.constant 0 : i32
    %2 = arith.minsi %1, %c0_i32 : i32
    %c0_i32_0 = arith.constant 0 : i32
    %c0_i32_1 = arith.constant 0 : i32
    return %2, %c0_i32_0 : i32, i32
  }
  func.func @transform_3(%arg0: i32, %arg1: i32) -> (i32, i32) {
    %c0_i32 = arith.constant 0 : i32
    %c0_i32_0 = arith.constant 0 : i32
    return %arg0, %c0_i32 : i32, i32
  }
}

</mosaic_0001>

<bundles_post_ra>
// kernel: tpu_custom_call.1
= control target key start
LH: loop header
LB: loop body
LE: loop exit
PB: predicated region body
PF: predicated region fallthrough
CT: control target
= control target key end

     0   :  { %8 = vsyncpa [#allocation4], 0  ;;  %s444_s0 = inlined_call_operand.hbm [shape: f32[16,32], index: 0, kind: input, shape index: {}]   ;;  %s445_s1 = inlined_call_operand.hbm [shape: f32[16,32], index: 1, kind: input, shape index: {}]   ;;  %s446_s2 = inlined_call_operand.hbm [shape: f32[16,32], index: 2, kind: input, shape index: {}]   ;;  %s447_s3 = inlined_call_operand.hbm [shape: f32[8,128], index: 3, kind: output, shape index: {}]  }
   0x1   :  { %9 = vsyncpa [#allocation7], 0 }
   0x2   :  { %10 = vsyncpa [#allocation5], 0  ;;  %s337_s12 = smov [#allocation6]   ;;  %s338_s14 = smov [#allocation3]  }
   0x3   :  { %s40_s13 = sshll.u32 %s337_s12, 4  ;;  %s22_s15 = sshll.u32 %s338_s14, 4  ;;  %s41_s13 = int_to_ptr.vmem [resolvable:$true] %s40_s13  ;;  %s364_s15 = int_to_ptr.vmem [resolvable:$true] %s22_s15 }
   0x4   :  { %s243_s18 = scalar_lea.hbm %s445_s1, 256 }
   0x5   :  { %p244_p0 = scmp.ne.s32.totalorder %s445_s1, %s243_s18  ;;  %p247_p1 = scmp.lt.u32.totalorder %s243_s18, %s445_s1 }
   0x7   :  { %p249_p2 = pnand %p247_p1, %p244_p0 }
   0x9   :  { %252 = shalt.err (!%p249_p2)
}
   0xa   :  { %s253_s23 = scalar_lea.vmem %s41_s13, 256  ;;  %p258_p4 = scmp.lt.s32.totalorder %s41_s13, %s41_s13 }
   0xb   :  { %p254_p3 = scmp.ne.s32.totalorder %s41_s13, %s253_s23  ;;  %p259_p5 = scmp.lt.s32.totalorder %s253_s23, %s253_s23 }
   0xd   :  { %p260_p6 = por %p259_p5, %p258_p4 }
   0xf   :  { %p261_p7 = pnand %p260_p6, %p254_p3 }
  0x11   :  { %264 = shalt.err (!%p261_p7)
}
  0x12   :  { %s339_s24 = smov 128   ;;  %s340_s25 = smov 8  }
  0x13   :  { %46 = dma.hbm_to_vmem [thread:$0]  %s445_s1, 256, %s41_s13, [#allocation7], %s339_s24, %s339_s24, %s340_s25  }
  0x14   :  { %s265_s30 = scalar_lea.hbm %s444_s0, 256 }
  0x15   :  { %p266_p8 = scmp.ne.s32.totalorder %s444_s0, %s265_s30  ;;  %p269_p9 = scmp.lt.u32.totalorder %s265_s30, %s444_s0 }
  0x17   :  { %p271_p10 = pnand %p269_p9, %p266_p8 }
  0x19   :  { %274 = shalt.err (!%p271_p10)
}
  0x1a   :  { %s275_s8 = scalar_lea.vmem %s364_s15, 256  ;;  %p280_p12 = scmp.lt.s32.totalorder %s364_s15, %s364_s15 }
  0x1b   :  { %p276_p11 = scmp.ne.s32.totalorder %s364_s15, %s275_s8  ;;  %p281_p13 = scmp.lt.s32.totalorder %s275_s8, %s275_s8 }
  0x1d   :  { %p282_p0 = por %p281_p13, %p280_p12 }
  0x1f   :  { %p283_p1 = pnand %p282_p0, %p276_p11 }
  0x21   :  { %286 = shalt.err (!%p283_p1)
}
  0x22   :  { %28 = dma.hbm_to_vmem [thread:$0]  %s444_s0, 256, %s364_s15, [#allocation4], %s339_s24, %s339_s24, %s340_s25  }
  0x23   :  { %s341_s10 = smov [#allocation8]   ;;  %s287_s14 = scalar_lea.hbm %s446_s2, 256 }
  0x24   :  { %s58_s11 = sshll.u32 %s341_s10, 4  ;;  %p288_p2 = scmp.ne.s32.totalorder %s446_s2, %s287_s14  ;;  %s59_s11 = int_to_ptr.vmem [resolvable:$true] %s58_s11 }
  0x25   :  { %p291_p3 = scmp.lt.u32.totalorder %s287_s14, %s446_s2 }
  0x27   :  { %p293_p4 = pnand %p291_p3, %p288_p2 }
  0x29   :  { %296 = shalt.err (!%p293_p4)
}
  0x2a   :  { %s297_s20 = scalar_lea.vmem %s59_s11, 256  ;;  %p302_p6 = scmp.lt.s32.totalorder %s59_s11, %s59_s11 }
  0x2b   :  { %p298_p5 = scmp.ne.s32.totalorder %s59_s11, %s297_s20  ;;  %p303_p7 = scmp.lt.s32.totalorder %s297_s20, %s297_s20 }
  0x2d   :  { %p304_p8 = por %p303_p7, %p302_p6 }
  0x2f   :  { %p305_p9 = pnand %p304_p8, %p298_p5 }
  0x31   :  { %308 = shalt.err (!%p305_p9)
}
  0x32   :  { %64 = dma.hbm_to_vmem [thread:$0]  %s446_s2, 256, %s59_s11, [#allocation7], %s339_s24, %s339_s24, %s340_s25  }
  0x33   :  { %331 = dma.done.wait [#allocation4], 256  }
  0x34   :  { %332 = vsyncadd [#allocation4], 4294967040 }
  0x35   :  { %333 = dma.done.wait [#allocation7], 512  }
  0x36   :  { %334 = vsyncadd [#allocation7], 4294966784  ;;  %v95_v0 = vld [vmem:[#allocation6] sm:$0xff]  ;;  %vm101_vm0 = vcmask 261120   ;;  %v93_v1 = vld [vmem:[#allocation3] sm:$0xff]  ;;  %vm90_vm1 = vcmask 7168  }
  0x37   :  { %v96_v2 = vld [vmem:[#allocation6 + $0x8] sm:$0xff]  ;;  %v112_v3 = vmul.f32 %v95_v0, %v95_v0  ;;  %v99_v4 = vmul.f32 %v93_v1, %v93_v1  ;;  %v94_v6 = vld [vmem:[#allocation3 + $0x8] sm:$0xff]  ;;  %v97_v9 = vld [vmem:[#allocation8] sm:$0xff]  ;;  %v136_v18 = vmul.f32 %v95_v0, %v93_v1  ;;  %v342_v26 = vmov 0.0   ;;  %s343_s2 = smov [#allocation9]  }
  0x38   :  { %v113_v5 = vmul.f32 %v96_v2, %v96_v2  ;;  %v100_v7 = vmul.f32 %v94_v6, %v94_v6  ;;  %v98_v8 = vld [vmem:[#allocation8 + $0x8] sm:$0xff]  ;;  %v124_v15 = vmul.f32 %v97_v9, %v97_v9  ;;  %v137_v19 = vmul.f32 %v96_v2, %v94_v6  ;;  %92 = vst.msk [vmem:[#allocation2 + $0x8] sm:$0xff] %vm90_vm1, %v342_v26  ;;  %s206_s21 = sshll.u32 %s343_s2, 4  ;;  %s207_s21 = int_to_ptr.vmem [resolvable:$true] %s206_s21 }
  0x39   :  { %v114_v10 = vsel %vm101_vm0, %v112_v3, 0.0  ;;  %v102_v11 = vsel %vm101_vm0, %v99_v4, 0.0  ;;  %v125_v14 = vmul.f32 %v98_v8, %v98_v8  ;;  %v138_v20 = vsel %vm101_vm0, %v136_v18, 0.0  ;;  %91 = vst.msk [vmem:[#allocation2] sm:$0xff] %vm90_vm1, %v342_v26  ;;  %s309_s23 = scalar_lea.vmem %s207_s21, 128  ;;  %p314_p11 = scmp.lt.s32.totalorder %s207_s21, %s207_s21 }
  0x3a   :  { %115 = vadd.xlane.f32.xlu1 %v114_v10  ;;  %103 = vadd.xlane.f32.xlu0 %v102_v11  ;;  %v117_v12 = vsel %vm101_vm0, %v113_v5, 0.0  ;;  %v105_v13 = vsel %vm101_vm0, %v100_v7, 0.0  ;;  %v126_v17 = vsel %vm101_vm0, %v124_v15, 0.0  ;;  %v141_v21 = vsel %vm101_vm0, %v137_v19, 0.0  ;;  %p310_p10 = scmp.ne.s32.totalorder %s207_s21, %s309_s23  ;;  %p315_p12 = scmp.lt.s32.totalorder %s309_s23, %s309_s23 }
  0x3b   :  { %v129_v16 = vsel %vm101_vm0, %v125_v14, 0.0  ;;  %v149_v22 = vmul.f32 %v98_v8, %v94_v6  ;;  %v148_v23 = vmul.f32 %v97_v9, %v93_v1  ;;  %v190_v15 = vlaneseq }
  0x3c   :  { %p316_p13 = por %p315_p12, %p314_p11 }
  0x3d   :  { %v153_v24 = vsel %vm101_vm0, %v149_v22, 0.0  ;;  %v150_v25 = vsel %vm101_vm0, %v148_v23, 0.0 }
  0x3e   :  { %118 = vadd.xlane.f32.xlu1 %v117_v12  ;;  %106 = vadd.xlane.f32.xlu0 %v105_v13  ;;  %p317_p0 = pnand %p316_p13, %p310_p10 }
  0x3f   :  { %v167_v60 = vld [vmem:[#allocation2 + $0x8] sm:$0xff] }
  0x40   :  { %v166_v63 = vld [vmem:[#allocation2] sm:$0xff] }
  0x42   :  { %130 = vadd.xlane.f32.xlu1 %v129_v16  ;;  %127 = vadd.xlane.f32.xlu0 %v126_v17  ;;  %v191_v16 = vshrl.u32 %v190_v15, 7  ;;  %v193_v17 = vand.u32 127, %v190_v15 }
  0x44   :  { %vm194_vm2 = vcmp.eq.s32.totalorder %v191_v16, 0  ;;  %vm195_vm3 = vcmp.eq.s32.totalorder %v193_v17, 0 }
  0x45   :  { %vm196_vm4 = vmand %vm194_vm2, %vm195_vm3 }
  0x46   :  { %139 = vadd.xlane.f32.xlu0 %v138_v20  ;;  %142 = vadd.xlane.f32.xlu1 %v141_v21 }
  0x4a   :  { %154 = vadd.xlane.f32.xlu1 %v153_v24  ;;  %151 = vadd.xlane.f32.xlu0 %v150_v25 }
  0xc7   :  { %v116_v27 = vpop.xlane.xlu1 %115  ;;  %v104_v28 = vpop.xlane.xlu0 %103 }
  0xc8   :  { %v120_v29 = vmax.f32 %v116_v27, 1e-16  ;;  %v108_v30 = vmax.f32 %v104_v28, 1e-16 }
  0xca   :  { %231 = vrsqrt.f32 %v120_v29 }
  0xcb   :  { %v119_v31 = vpop.xlane.xlu1 %118  ;;  %v107_v32 = vpop.xlane.xlu0 %106  ;;  %233 = vrsqrt.f32 %v108_v30 }
  0xcc   :  { %v121_v33 = vmax.f32 %v119_v31, 1e-16  ;;  %v109_v34 = vmax.f32 %v107_v32, 1e-16 }
  0xce   :  { %235 = vrsqrt.f32 %v121_v33 }
  0xcf   :  { %237 = vrsqrt.f32 %v109_v34  ;;  %v131_v35 = vpop.xlane.xlu1 %130  ;;  %v128_v36 = vpop.xlane.xlu0 %127 }
  0xd0   :  { %v133_v37 = vmax.f32 %v131_v35, 1e-16  ;;  %v132_v38 = vmax.f32 %v128_v36, 1e-16 }
  0xd2   :  { %239 = vrsqrt.f32 %v133_v37 }
  0xd3   :  { %241 = vrsqrt.f32 %v132_v38  ;;  %v143_v40 = vpop.xlane.xlu1 %142  ;;  %v140_v44 = vpop.xlane.xlu0 %139 }
  0xd4   :  { %v232_v39 = vpop.eup %231 }
  0xd5   :  { %v234_v41 = vpop.eup %233 }
  0xd6   :  { %v144_v47 = vmul.f32 %v234_v41, %v232_v39 }
  0xd7   :  { %v155_v48 = vpop.xlane.xlu1 %154  ;;  %v152_v51 = vpop.xlane.xlu0 %151 }
  0xd8   :  { %v236_v42 = vpop.eup %235  ;;  %v146_v55 = vmul.f32 %v144_v47, %v140_v44 }
  0xd9   :  { %v238_v43 = vpop.eup %237 }
  0xda   :  { %v145_v45 = vmul.f32 %v238_v43, %v236_v42 }
  0xdc   :  { %v240_v46 = vpop.eup %239  ;;  %v147_v53 = vmul.f32 %v145_v45, %v143_v40 }
  0xdd   :  { %v242_v49 = vpop.eup %241  ;;  %v157_v50 = vmul.f32 %v240_v46, %v238_v43 }
  0xde   :  { %v156_v52 = vmul.f32 %v242_v49, %v234_v41 }
  0xdf   :  { %v159_v54 = vmul.f32 %v157_v50, %v155_v48 }
  0xe0   :  { %v158_v56 = vmul.f32 %v156_v52, %v152_v51 }
  0xe1   :  { %v161_v57 = vsub.f32 %v159_v54, %v147_v53 }
  0xe2   :  { %v160_v58 = vsub.f32 %v158_v56, %v146_v55 }
  0xe3   :  { %v163_v59 = vadd.f32 1.0, %v161_v57 }
  0xe4   :  { %v162_v61 = vadd.f32 1.0, %v160_v58 }
  0xe5   :  { %v165_v62 = vmax.f32 %v163_v59, 0.0 }
  0xe6   :  { %v164_v0 = vmax.f32 %v162_v61, 0.0 }
  0xe7   :  { %v169_v1 = vadd.f32 %v167_v60, %v165_v62 }
  0xe8   :  { %v168_v2 = vadd.f32 %v166_v63, %v164_v0 }
  0xe9   :  { %172 = vst.msk [vmem:[#allocation2 + $0x8] sm:$0xff] %vm90_vm1, %v169_v1 }
  0xea   :  { %171 = vst.msk [vmem:[#allocation2] sm:$0xff] %vm90_vm1, %v168_v2 }
  0xf0   :  { %v177_v3 = vld [vmem:[#allocation2 + $0x8] sm:$0xff] }
  0xf1   :  { %v176_v4 = vld [vmem:[#allocation2] sm:$0xff]  ;;  %v179_v5 = vsel %vm90_vm1, %v177_v3, 0.0 }
  0xf2   :  { %v178_v6 = vsel %vm90_vm1, %v176_v4, 0.0 }
  0xf3   :  { %v180_v7 = vadd.f32 %v179_v5, %v178_v6 }
  0xf5   :  { %181 = vadd.xlane.f32.xlu0 %v180_v7 }
 0x182   :  { %v182_v8 = vpop.xlane.xlu0 %181 }
 0x183   :  { %v183_v9 = vrot.slane %v182_v8, 4 }
 0x185   :  { %v184_v10 = vadd.f32 %v183_v9, %v182_v8 }
 0x187   :  { %v185_v11 = vrot.slane %v184_v10, 2 }
 0x189   :  { %v186_v12 = vadd.f32 %v185_v11, %v184_v10 }
 0x18b   :  { %v187_v13 = vrot.slane %v186_v12, 1 }
 0x18d   :  { %v188_v14 = vadd.f32 %v187_v13, %v186_v12 }
 0x18f   :  { %222 = vpush %v188_v14 }
 0x1c0   :  { %s223_s22 = spop %222 }
 0x1c1   :  { %v197_v18 = vstv %s223_s22 }
 0x1c2   :  { %v198_v19 = vsel %vm196_vm4, %v197_v18, 0.0 }
 0x1c3   :  { %199 = vst [vmem:[#allocation9] sm:$0xff] %v198_v19 }
 0x1c4   :  { %320 = shalt.err (!%p317_p0)
}
 0x1c5   :  { %s321_s26 = scalar_lea.hbm %s447_s3, 128 }
 0x1c6   :  { %p322_p1 = scmp.ne.s32.totalorder %s447_s3, %s321_s26  ;;  %p325_p2 = scmp.lt.u32.totalorder %s321_s26, %s447_s3 }
 0x1c8   :  { %p327_p3 = pnand %p325_p2, %p322_p1 }
 0x1ca   :  { %330 = shalt.err (!%p327_p3)
}
 0x1cb   :  { %209 = dma.vmem_to_hbm [thread:$0]  %s207_s21, 128, %s447_s3, [#allocation5]  }
 0x1cc   :  { %335 = dma.done.wait [#allocation5], 128  }
 0x1cd   :  { %336 = vsyncadd [#allocation5], 4294967168 }
 0x1ce   :  { %213 = vsyncpa [#allocation4], 1 }
 0x1cf   :  { %214 = vsyncpa [#allocation7], 1 }
 0x1d0   :  { %215 = vsyncpa [#allocation5], 1 }

</bundles_post_ra>
